<compile_context>
chip_gen: v6e
topology: v6e:2x2x1
jax: 0.10.0
libtpu: 0.0.40
codegen_flags: <defaults>
</compile_context>

<pallas_src>
import math
from functools import lru_cache, partial

import numpy as np
import jax
import jax.numpy as jnp
from jax.experimental import pallas as pl
from jax.experimental.pallas import tpu as pltpu

# ---- synthetic landmark-group config (deterministic, stands in for the repo's `globals`) ----
LANDMARK_OFFSETS_MAP = {"left_hand": 0, "right_hand": 4, "pose": 8, "face": 12}
N_LANDMARKS_MAP = {"left_hand": 4, "right_hand": 4, "pose": 4, "face": 4}
NAMED_LANDMARK_SUBSETS = {"POSE_SUBSET": [0, 2]}
N_LANDMARKS_TOTAL = 16
N_COORDS = 3  # (x, y, z)


def get_landmarks_to_include_idxs(landmarks_to_include):
    idxs = []
    for lmark, to_include in landmarks_to_include.items():
        if to_include is None:
            continue
        offset = LANDMARK_OFFSETS_MAP[lmark]
        n_landmarks = N_LANDMARKS_MAP[lmark]
        for var in to_include:
            if var == "ALL":
                idxs.extend(range(offset, offset + n_landmarks))
            else:
                idxs.extend(v + offset for v in NAMED_LANDMARK_SUBSETS[var])
    return sorted(idxs)


@lru_cache(maxsize=None)
def frame_index_map(curr_frames, num_frames):
    """Output frame t -> input frame index; mirrors repeat_interleave(to_repeat)[:num_frames]."""
    rest = num_frames - curr_frames
    to_repeat = int(math.ceil(num_frames / curr_frames)) if rest > 0 else 1
    return tuple(min(t // to_repeat, curr_frames - 1) for t in range(num_frames))


def _preprocess_kernel(fidx_ref, x_ref, o_ref, *, nf, l_sel):
    # fidx_ref: (B, nf) int32 in SMEM (scalar-prefetched frame-repeat table)
    # x_ref   : (1, t_pad, c_out, l_sel) whole padded sample; coords in sublanes,
    #           selected landmarks in lanes.
    # o_ref   : (1, c_out, nf * l_sel) lane-dense output (one wide row per coordinate).
    b = pl.program_id(0)
    fmax = jnp.float32(jnp.finfo(jnp.float32).max)
    fmin = jnp.float32(jnp.finfo(jnp.float32).min)
    # nf is small & static: unrolled loop; only the source frame index is dynamic,
    # so every store offset below is a static lane offset.
    for t in range(nf):
        f = fidx_ref[b, t]
        frame = x_ref[0, f]                                        # (c_out, l_sel)
        # torch.nan_to_num semantics: nan -> 0, +inf -> f32 max, -inf -> f32 min.
        # TODO(synk): torch gates nan_to_num on "any NaN present in the gathered tensor";
        # here it is applied unconditionally (identical for finite inputs / inputs with NaN).
        frame = jnp.where(jnp.isnan(frame), jnp.float32(0.0), frame)
        frame = jnp.where(frame == jnp.inf, fmax, frame)
        frame = jnp.where(frame == -jnp.inf, fmin, frame)
        o_ref[0, :, t * l_sel:(t + 1) * l_sel] = frame


class PreprocessLayerPallas:
    def __init__(self, num_frames, landmarks_to_include, drop_z):
        self.num_frames = num_frames
        self.landmarks_idxs = tuple(get_landmarks_to_include_idxs(landmarks_to_include))
        self.drop_z = drop_z
        self.c_out = 2 if drop_z else N_COORDS
        self._lm_arr = jnp.asarray(self.landmarks_idxs, dtype=jnp.int32)
        # jit the (selection + pallas_call) forward; recompiles only per distinct (B, t_pad).
        self._fwd = jax.jit(self._forward)

    def __call__(self, X):
        # ---- host glue: stack/pad samples, build the per-sample frame gather table ----
        if isinstance(X, list):
            samples = [np.asarray(x, dtype=np.float32) for x in X]
        elif isinstance(X, np.ndarray):
            samples = [np.asarray(X, dtype=np.float32)]
        else:
            raise ValueError(f"X is of type {type(X)}, not expected")
        B = len(samples)
        t_pad = max(s.shape[0] for s in samples)
        x_pad = np.zeros((B, t_pad, N_LANDMARKS_TOTAL, N_COORDS), dtype=np.float32)
        fidx = np.zeros((B, self.num_frames), dtype=np.int32)
        for b, s in enumerate(samples):
            x_pad[b, : s.shape[0]] = s
            fidx[b] = frame_index_map(s.shape[0], self.num_frames)
        out = self._fwd(jnp.asarray(x_pad), jnp.asarray(fidx))    # (B, c_out, nf*l_sel)
        l_sel = len(self.landmarks_idxs)
        # free reshape: (B, c_out, nf*l_sel) -> (B, c_out, nf, l_sel, 1)  == torch output
        return out.reshape(B, self.c_out, self.num_frames, l_sel, 1)

    def _forward(self, x_pad, fidx):
        B, t_pad, L, C = x_pad.shape
        nf, c_out = self.num_frames, self.c_out
        l_sel = len(self.landmarks_idxs)

        # Static landmark gather + drop_z + layout flip (landmarks -> lane dim) done as
        # XLA layout plumbing outside the kernel: (B, t_pad, L, C) -> (B, t_pad, c_out, l_sel).
        x_in = jnp.transpose(x_pad[:, :, self._lm_arr, :c_out], (0, 1, 3, 2))

        kernel = partial(_preprocess_kernel, nf=nf, l_sel=l_sel)
        grid_spec = pltpu.PrefetchScalarGridSpec(
            num_scalar_prefetch=1,     # fidx lives in SMEM, drives the in-kernel frame gather
            grid=(B,),
            in_specs=[
                pl.BlockSpec((1, t_pad, c_out, l_sel), lambda b, fi: (b, 0, 0, 0)),
            ],
            out_specs=pl.BlockSpec((1, c_out, nf * l_sel), lambda b, fi: (b, 0, 0)),
        )
        return pl.pallas_call(
            kernel,
            grid_spec=grid_spec,
            out_shape=jax.ShapeDtypeStruct((B, c_out, nf * l_sel), jnp.float32),
            compiler_params=pltpu.CompilerParams(
                dimension_semantics=("parallel",)   # batch axis -> both TCs on v7x
            ),
        )(fidx, x_in)


def reference_numpy(X_list, num_frames, lm_idxs, drop_z):
    """Mirrors the torch module exactly (repeat_interleave, select, conditional nan_to_num)."""
    normed = []
    for x in X_list:
        x = np.asarray(x, dtype=np.float32)
        curr = x.shape[0]
        rest = num_frames - curr
        to_repeat = int(math.ceil(num_frames / curr)) if rest > 0 else 1
        normed.append(np.repeat(x, to_repeat, axis=0)[:num_frames])
    X = np.stack(normed)                      # (B, T, L, C)
    if drop_z:
        X = X[..., :2]
    X = X[:, :, list(lm_idxs)]
    if np.isnan(X.min()):
        X = np.nan_to_num(X)
    X = np.moveaxis(X, (1, 2, 3), (2, 3, 1))  # (B, C, T, L_sel)
    return X[..., None]                       # (B, C, T, L_sel, 1)


if __name__ == "__main__":
    num_frames = 8
    landmarks_to_include = {
        "left_hand": ["ALL"],
        "right_hand": ["ALL"],
        "pose": ["POSE_SUBSET"],
        "face": None,
    }
    layer = PreprocessLayerPallas(num_frames, landmarks_to_include, drop_z=True)

    key = jax.random.PRNGKey(0)
    k0, k1 = jax.random.split(key)
    # list input: two samples with different frame counts (5 and 8) to exercise the
    # repeat_interleave-based frame normalization. np.array(...) copies -> writable.
    x0 = np.array(jax.random.normal(k0, (5, N_LANDMARKS_TOTAL, N_COORDS), jnp.float32))
    x1 = np.array(jax.random.normal(k1, (8, N_LANDMARKS_TOTAL, N_COORDS), jnp.float32))
    x0[1, 3, 0] = np.nan  # exercise the nan_to_num path (frame 1 / landmark 3 are used & kept)
    X = [x0, x1]

    out = jax.block_until_ready(layer(X))

    ref = reference_numpy(X, num_frames, layer.landmarks_idxs, drop_z=True)
    assert out.shape == ref.shape == (2, 2, num_frames, len(layer.landmarks_idxs), 1)
    np.testing.assert_allclose(np.asarray(out), ref, rtol=0, atol=0)
    print("KERNEL_OK")
</pallas_src>

<mosaic_0001>
module attributes {stable_mosaic.version = 11 : i64} {
  func.func @_preprocess_kernel(%arg0: i32, %arg1: memref<2x8xi32, #tpu.memory_space<smem>>, %arg2: memref<1x8x2x10xf32, #tpu.memory_space<vmem>>, %arg3: memref<1x2x80xf32, #tpu.memory_space<vmem>>) attributes {dimension_semantics = [#tpu.dimension_semantics<parallel>], iteration_bounds = array<i64: 2>, scalar_prefetch = 1 : i64, scratch_operands = 0 : i64, tpu.core_type = #tpu.core_type<tc>, window_params = [{transform_indices = @transform_0, window_bounds = array<i64: 1, 8, 2, 10>}, {transform_indices = @transform_1, window_bounds = array<i64: 1, 2, 80>}]} {
    %0 = arith.index_cast %arg0 : i32 to index
    %c0 = arith.constant 0 : index
    %1 = memref.load %arg1[%0, %c0] : memref<2x8xi32, #tpu.memory_space<smem>>
    %c0_0 = arith.constant 0 : index
    %2 = arith.index_cast %1 : i32 to index
    %c0_1 = arith.constant 0 : index
    %c0_2 = arith.constant 0 : index
    %3 = vector.load %arg2[%c0_0, %2, %c0_1, %c0_2] : memref<1x8x2x10xf32, #tpu.memory_space<vmem>>, vector<1x1x2x10xf32>
    %4 = vector.shape_cast %3 : vector<1x1x2x10xf32> to vector<2x10xf32>
    %5 = arith.cmpf one, %4, %4 : vector<2x10xf32>
    %cst = arith.constant 0.000000e+00 : f32
    %6 = vector.broadcast %cst : f32 to vector<2x10xf32>
    %7 = arith.select %5, %6, %4 : vector<2x10xi1>, vector<2x10xf32>
    %cst_3 = arith.constant 0x7F800000 : f32
    %8 = vector.broadcast %cst_3 : f32 to vector<2x10xf32>
    %9 = arith.cmpf oeq, %7, %8 : vector<2x10xf32>
    %cst_4 = arith.constant 3.40282347E+38 : f32
    %10 = vector.broadcast %cst_4 : f32 to vector<2x10xf32>
    %11 = arith.select %9, %10, %7 : vector<2x10xi1>, vector<2x10xf32>
    %cst_5 = arith.constant 0xFF800000 : f32
    %12 = vector.broadcast %cst_5 : f32 to vector<2x10xf32>
    %13 = arith.cmpf oeq, %11, %12 : vector<2x10xf32>
    %cst_6 = arith.constant -3.40282347E+38 : f32
    %14 = vector.broadcast %cst_6 : f32 to vector<2x10xf32>
    %15 = arith.select %13, %14, %11 : vector<2x10xi1>, vector<2x10xf32>
    %c0_7 = arith.constant 0 : index
    %c0_8 = arith.constant 0 : index
    %c0_9 = arith.constant 0 : index
    %16 = vector.load %arg3[%c0_7, %c0_8, %c0_9] : memref<1x2x80xf32, #tpu.memory_space<vmem>>, vector<1x2x10xf32>
    %17 = vector.shape_cast %16 : vector<1x2x10xf32> to vector<2x10xf32>
    %18 = vector.shape_cast %15 : vector<2x10xf32> to vector<1x2x10xf32>
    tpu.vector_store %arg3[%c0_7, %c0_8, %c0_9], %18 {strides = array<i32>} : memref<1x2x80xf32, #tpu.memory_space<vmem>>, vector<1x2x10xf32>,
    %19 = arith.index_cast %arg0 : i32 to index
    %c1 = arith.constant 1 : index
    %20 = memref.load %arg1[%19, %c1] : memref<2x8xi32, #tpu.memory_space<smem>>
    %c0_10 = arith.constant 0 : index
    %21 = arith.index_cast %20 : i32 to index
    %c0_11 = arith.constant 0 : index
    %c0_12 = arith.constant 0 : index
    %22 = vector.load %arg2[%c0_10, %21, %c0_11, %c0_12] : memref<1x8x2x10xf32, #tpu.memory_space<vmem>>, vector<1x1x2x10xf32>
    %23 = vector.shape_cast %22 : vector<1x1x2x10xf32> to vector<2x10xf32>
    %24 = arith.cmpf one, %23, %23 : vector<2x10xf32>
    %cst_13 = arith.constant 0.000000e+00 : f32
    %25 = vector.broadcast %cst_13 : f32 to vector<2x10xf32>
    %26 = arith.select %24, %25, %23 : vector<2x10xi1>, vector<2x10xf32>
    %cst_14 = arith.constant 0x7F800000 : f32
    %27 = vector.broadcast %cst_14 : f32 to vector<2x10xf32>
    %28 = arith.cmpf oeq, %26, %27 : vector<2x10xf32>
    %cst_15 = arith.constant 3.40282347E+38 : f32
    %29 = vector.broadcast %cst_15 : f32 to vector<2x10xf32>
    %30 = arith.select %28, %29, %26 : vector<2x10xi1>, vector<2x10xf32>
    %cst_16 = arith.constant 0xFF800000 : f32
    %31 = vector.broadcast %cst_16 : f32 to vector<2x10xf32>
    %32 = arith.cmpf oeq, %30, %31 : vector<2x10xf32>
    %cst_17 = arith.constant -3.40282347E+38 : f32
    %33 = vector.broadcast %cst_17 : f32 to vector<2x10xf32>
    %34 = arith.select %32, %33, %30 : vector<2x10xi1>, vector<2x10xf32>
    %c0_18 = arith.constant 0 : index
    %c0_19 = arith.constant 0 : index
    %c10 = arith.constant 10 : index
    %35 = vector.load %arg3[%c0_18, %c0_19, %c10] : memref<1x2x80xf32, #tpu.memory_space<vmem>>, vector<1x2x10xf32>
    %36 = vector.shape_cast %35 : vector<1x2x10xf32> to vector<2x10xf32>
    %37 = vector.shape_cast %34 : vector<2x10xf32> to vector<1x2x10xf32>
    tpu.vector_store %arg3[%c0_18, %c0_19, %c10], %37 {strides = array<i32>} : memref<1x2x80xf32, #tpu.memory_space<vmem>>, vector<1x2x10xf32>,
    %38 = arith.index_cast %arg0 : i32 to index
    %c2 = arith.constant 2 : index
    %39 = memref.load %arg1[%38, %c2] : memref<2x8xi32, #tpu.memory_space<smem>>
    %c0_20 = arith.constant 0 : index
    %40 = arith.index_cast %39 : i32 to index
    %c0_21 = arith.constant 0 : index
    %c0_22 = arith.constant 0 : index
    %41 = vector.load %arg2[%c0_20, %40, %c0_21, %c0_22] : memref<1x8x2x10xf32, #tpu.memory_space<vmem>>, vector<1x1x2x10xf32>
    %42 = vector.shape_cast %41 : vector<1x1x2x10xf32> to vector<2x10xf32>
    %43 = arith.cmpf one, %42, %42 : vector<2x10xf32>
    %cst_23 = arith.constant 0.000000e+00 : f32
    %44 = vector.broadcast %cst_23 : f32 to vector<2x10xf32>
    %45 = arith.select %43, %44, %42 : vector<2x10xi1>, vector<2x10xf32>
    %cst_24 = arith.constant 0x7F800000 : f32
    %46 = vector.broadcast %cst_24 : f32 to vector<2x10xf32>
    %47 = arith.cmpf oeq, %45, %46 : vector<2x10xf32>
    %cst_25 = arith.constant 3.40282347E+38 : f32
    %48 = vector.broadcast %cst_25 : f32 to vector<2x10xf32>
    %49 = arith.select %47, %48, %45 : vector<2x10xi1>, vector<2x10xf32>
    %cst_26 = arith.constant 0xFF800000 : f32
    %50 = vector.broadcast %cst_26 : f32 to vector<2x10xf32>
    %51 = arith.cmpf oeq, %49, %50 : vector<2x10xf32>
    %cst_27 = arith.constant -3.40282347E+38 : f32
    %52 = vector.broadcast %cst_27 : f32 to vector<2x10xf32>
    %53 = arith.select %51, %52, %49 : vector<2x10xi1>, vector<2x10xf32>
    %c0_28 = arith.constant 0 : index
    %c0_29 = arith.constant 0 : index
    %c20 = arith.constant 20 : index
    %54 = vector.load %arg3[%c0_28, %c0_29, %c20] : memref<1x2x80xf32, #tpu.memory_space<vmem>>, vector<1x2x10xf32>
    %55 = vector.shape_cast %54 : vector<1x2x10xf32> to vector<2x10xf32>
    %56 = vector.shape_cast %53 : vector<2x10xf32> to vector<1x2x10xf32>
    tpu.vector_store %arg3[%c0_28, %c0_29, %c20], %56 {strides = array<i32>} : memref<1x2x80xf32, #tpu.memory_space<vmem>>, vector<1x2x10xf32>,
    %57 = arith.index_cast %arg0 : i32 to index
    %c3 = arith.constant 3 : index
    %58 = memref.load %arg1[%57, %c3] : memref<2x8xi32, #tpu.memory_space<smem>>
    %c0_30 = arith.constant 0 : index
    %59 = arith.index_cast %58 : i32 to index
    %c0_31 = arith.constant 0 : index
    %c0_32 = arith.constant 0 : index
    %60 = vector.load %arg2[%c0_30, %59, %c0_31, %c0_32] : memref<1x8x2x10xf32, #tpu.memory_space<vmem>>, vector<1x1x2x10xf32>
    %61 = vector.shape_cast %60 : vector<1x1x2x10xf32> to vector<2x10xf32>
    %62 = arith.cmpf one, %61, %61 : vector<2x10xf32>
    %cst_33 = arith.constant 0.000000e+00 : f32
    %63 = vector.broadcast %cst_33 : f32 to vector<2x10xf32>
    %64 = arith.select %62, %63, %61 : vector<2x10xi1>, vector<2x10xf32>
    %cst_34 = arith.constant 0x7F800000 : f32
    %65 = vector.broadcast %cst_34 : f32 to vector<2x10xf32>
    %66 = arith.cmpf oeq, %64, %65 : vector<2x10xf32>
    %cst_35 = arith.constant 3.40282347E+38 : f32
    %67 = vector.broadcast %cst_35 : f32 to vector<2x10xf32>
    %68 = arith.select %66, %67, %64 : vector<2x10xi1>, vector<2x10xf32>
    %cst_36 = arith.constant 0xFF800000 : f32
    %69 = vector.broadcast %cst_36 : f32 to vector<2x10xf32>
    %70 = arith.cmpf oeq, %68, %69 : vector<2x10xf32>
    %cst_37 = arith.constant -3.40282347E+38 : f32
    %71 = vector.broadcast %cst_37 : f32 to vector<2x10xf32>
    %72 = arith.select %70, %71, %68 : vector<2x10xi1>, vector<2x10xf32>
    %c0_38 = arith.constant 0 : index
    %c0_39 = arith.constant 0 : index
    %c30 = arith.constant 30 : index
    %73 = vector.load %arg3[%c0_38, %c0_39, %c30] : memref<1x2x80xf32, #tpu.memory_space<vmem>>, vector<1x2x10xf32>
    %74 = vector.shape_cast %73 : vector<1x2x10xf32> to vector<2x10xf32>
    %75 = vector.shape_cast %72 : vector<2x10xf32> to vector<1x2x10xf32>
    tpu.vector_store %arg3[%c0_38, %c0_39, %c30], %75 {strides = array<i32>} : memref<1x2x80xf32, #tpu.memory_space<vmem>>, vector<1x2x10xf32>,
    %76 = arith.index_cast %arg0 : i32 to index
    %c4 = arith.constant 4 : index
    %77 = memref.load %arg1[%76, %c4] : memref<2x8xi32, #tpu.memory_space<smem>>
    %c0_40 = arith.constant 0 : index
    %78 = arith.index_cast %77 : i32 to index
    %c0_41 = arith.constant 0 : index
    %c0_42 = arith.constant 0 : index
    %79 = vector.load %arg2[%c0_40, %78, %c0_41, %c0_42] : memref<1x8x2x10xf32, #tpu.memory_space<vmem>>, vector<1x1x2x10xf32>
    %80 = vector.shape_cast %79 : vector<1x1x2x10xf32> to vector<2x10xf32>
    %81 = arith.cmpf one, %80, %80 : vector<2x10xf32>
    %cst_43 = arith.constant 0.000000e+00 : f32
    %82 = vector.broadcast %cst_43 : f32 to vector<2x10xf32>
    %83 = arith.select %81, %82, %80 : vector<2x10xi1>, vector<2x10xf32>
    %cst_44 = arith.constant 0x7F800000 : f32
    %84 = vector.broadcast %cst_44 : f32 to vector<2x10xf32>
    %85 = arith.cmpf oeq, %83, %84 : vector<2x10xf32>
    %cst_45 = arith.constant 3.40282347E+38 : f32
    %86 = vector.broadcast %cst_45 : f32 to vector<2x10xf32>
    %87 = arith.select %85, %86, %83 : vector<2x10xi1>, vector<2x10xf32>
    %cst_46 = arith.constant 0xFF800000 : f32
    %88 = vector.broadcast %cst_46 : f32 to vector<2x10xf32>
    %89 = arith.cmpf oeq, %87, %88 : vector<2x10xf32>
    %cst_47 = arith.constant -3.40282347E+38 : f32
    %90 = vector.broadcast %cst_47 : f32 to vector<2x10xf32>
    %91 = arith.select %89, %90, %87 : vector<2x10xi1>, vector<2x10xf32>
    %c0_48 = arith.constant 0 : index
    %c0_49 = arith.constant 0 : index
    %c40 = arith.constant 40 : index
    %92 = vector.load %arg3[%c0_48, %c0_49, %c40] : memref<1x2x80xf32, #tpu.memory_space<vmem>>, vector<1x2x10xf32>
    %93 = vector.shape_cast %92 : vector<1x2x10xf32> to vector<2x10xf32>
    %94 = vector.shape_cast %91 : vector<2x10xf32> to vector<1x2x10xf32>
    tpu.vector_store %arg3[%c0_48, %c0_49, %c40], %94 {strides = array<i32>} : memref<1x2x80xf32, #tpu.memory_space<vmem>>, vector<1x2x10xf32>,
    %95 = arith.index_cast %arg0 : i32 to index
    %c5 = arith.constant 5 : index
    %96 = memref.load %arg1[%95, %c5] : memref<2x8xi32, #tpu.memory_space<smem>>
    %c0_50 = arith.constant 0 : index
    %97 = arith.index_cast %96 : i32 to index
    %c0_51 = arith.constant 0 : index
    %c0_52 = arith.constant 0 : index
    %98 = vector.load %arg2[%c0_50, %97, %c0_51, %c0_52] : memref<1x8x2x10xf32, #tpu.memory_space<vmem>>, vector<1x1x2x10xf32>
    %99 = vector.shape_cast %98 : vector<1x1x2x10xf32> to vector<2x10xf32>
    %100 = arith.cmpf one, %99, %99 : vector<2x10xf32>
    %cst_53 = arith.constant 0.000000e+00 : f32
    %101 = vector.broadcast %cst_53 : f32 to vector<2x10xf32>
    %102 = arith.select %100, %101, %99 : vector<2x10xi1>, vector<2x10xf32>
    %cst_54 = arith.constant 0x7F800000 : f32
    %103 = vector.broadcast %cst_54 : f32 to vector<2x10xf32>
    %104 = arith.cmpf oeq, %102, %103 : vector<2x10xf32>
    %cst_55 = arith.constant 3.40282347E+38 : f32
    %105 = vector.broadcast %cst_55 : f32 to vector<2x10xf32>
    %106 = arith.select %104, %105, %102 : vector<2x10xi1>, vector<2x10xf32>
    %cst_56 = arith.constant 0xFF800000 : f32
    %107 = vector.broadcast %cst_56 : f32 to vector<2x10xf32>
    %108 = arith.cmpf oeq, %106, %107 : vector<2x10xf32>
    %cst_57 = arith.constant -3.40282347E+38 : f32
    %109 = vector.broadcast %cst_57 : f32 to vector<2x10xf32>
    %110 = arith.select %108, %109, %106 : vector<2x10xi1>, vector<2x10xf32>
    %c0_58 = arith.constant 0 : index
    %c0_59 = arith.constant 0 : index
    %c50 = arith.constant 50 : index
    %111 = vector.load %arg3[%c0_58, %c0_59, %c50] : memref<1x2x80xf32, #tpu.memory_space<vmem>>, vector<1x2x10xf32>
    %112 = vector.shape_cast %111 : vector<1x2x10xf32> to vector<2x10xf32>
    %113 = vector.shape_cast %110 : vector<2x10xf32> to vector<1x2x10xf32>
    tpu.vector_store %arg3[%c0_58, %c0_59, %c50], %113 {strides = array<i32>} : memref<1x2x80xf32, #tpu.memory_space<vmem>>, vector<1x2x10xf32>,
    %114 = arith.index_cast %arg0 : i32 to index
    %c6 = arith.constant 6 : index
    %115 = memref.load %arg1[%114, %c6] : memref<2x8xi32, #tpu.memory_space<smem>>
    %c0_60 = arith.constant 0 : index
    %116 = arith.index_cast %115 : i32 to index
    %c0_61 = arith.constant 0 : index
    %c0_62 = arith.constant 0 : index
    %117 = vector.load %arg2[%c0_60, %116, %c0_61, %c0_62] : memref<1x8x2x10xf32, #tpu.memory_space<vmem>>, vector<1x1x2x10xf32>
    %118 = vector.shape_cast %117 : vector<1x1x2x10xf32> to vector<2x10xf32>
    %119 = arith.cmpf one, %118, %118 : vector<2x10xf32>
    %cst_63 = arith.constant 0.000000e+00 : f32
    %120 = vector.broadcast %cst_63 : f32 to vector<2x10xf32>
    %121 = arith.select %119, %120, %118 : vector<2x10xi1>, vector<2x10xf32>
    %cst_64 = arith.constant 0x7F800000 : f32
    %122 = vector.broadcast %cst_64 : f32 to vector<2x10xf32>
    %123 = arith.cmpf oeq, %121, %122 : vector<2x10xf32>
    %cst_65 = arith.constant 3.40282347E+38 : f32
    %124 = vector.broadcast %cst_65 : f32 to vector<2x10xf32>
    %125 = arith.select %123, %124, %121 : vector<2x10xi1>, vector<2x10xf32>
    %cst_66 = arith.constant 0xFF800000 : f32
    %126 = vector.broadcast %cst_66 : f32 to vector<2x10xf32>
    %127 = arith.cmpf oeq, %125, %126 : vector<2x10xf32>
    %cst_67 = arith.constant -3.40282347E+38 : f32
    %128 = vector.broadcast %cst_67 : f32 to vector<2x10xf32>
    %129 = arith.select %127, %128, %125 : vector<2x10xi1>, vector<2x10xf32>
    %c0_68 = arith.constant 0 : index
    %c0_69 = arith.constant 0 : index
    %c60 = arith.constant 60 : index
    %130 = vector.load %arg3[%c0_68, %c0_69, %c60] : memref<1x2x80xf32, #tpu.memory_space<vmem>>, vector<1x2x10xf32>
    %131 = vector.shape_cast %130 : vector<1x2x10xf32> to vector<2x10xf32>
    %132 = vector.shape_cast %129 : vector<2x10xf32> to vector<1x2x10xf32>
    tpu.vector_store %arg3[%c0_68, %c0_69, %c60], %132 {strides = array<i32>} : memref<1x2x80xf32, #tpu.memory_space<vmem>>, vector<1x2x10xf32>,
    %133 = arith.index_cast %arg0 : i32 to index
    %c7 = arith.constant 7 : index
    %134 = memref.load %arg1[%133, %c7] : memref<2x8xi32, #tpu.memory_space<smem>>
    %c0_70 = arith.constant 0 : index
    %135 = arith.index_cast %134 : i32 to index
    %c0_71 = arith.constant 0 : index
    %c0_72 = arith.constant 0 : index
    %136 = vector.load %arg2[%c0_70, %135, %c0_71, %c0_72] : memref<1x8x2x10xf32, #tpu.memory_space<vmem>>, vector<1x1x2x10xf32>
    %137 = vector.shape_cast %136 : vector<1x1x2x10xf32> to vector<2x10xf32>
    %138 = arith.cmpf one, %137, %137 : vector<2x10xf32>
    %cst_73 = arith.constant 0.000000e+00 : f32
    %139 = vector.broadcast %cst_73 : f32 to vector<2x10xf32>
    %140 = arith.select %138, %139, %137 : vector<2x10xi1>, vector<2x10xf32>
    %cst_74 = arith.constant 0x7F800000 : f32
    %141 = vector.broadcast %cst_74 : f32 to vector<2x10xf32>
    %142 = arith.cmpf oeq, %140, %141 : vector<2x10xf32>
    %cst_75 = arith.constant 3.40282347E+38 : f32
    %143 = vector.broadcast %cst_75 : f32 to vector<2x10xf32>
    %144 = arith.select %142, %143, %140 : vector<2x10xi1>, vector<2x10xf32>
    %cst_76 = arith.constant 0xFF800000 : f32
    %145 = vector.broadcast %cst_76 : f32 to vector<2x10xf32>
    %146 = arith.cmpf oeq, %144, %145 : vector<2x10xf32>
    %cst_77 = arith.constant -3.40282347E+38 : f32
    %147 = vector.broadcast %cst_77 : f32 to vector<2x10xf32>
    %148 = arith.select %146, %147, %144 : vector<2x10xi1>, vector<2x10xf32>
    %c0_78 = arith.constant 0 : index
    %c0_79 = arith.constant 0 : index
    %c70 = arith.constant 70 : index
    %149 = vector.load %arg3[%c0_78, %c0_79, %c70] : memref<1x2x80xf32, #tpu.memory_space<vmem>>, vector<1x2x10xf32>
    %150 = vector.shape_cast %149 : vector<1x2x10xf32> to vector<2x10xf32>
    %151 = vector.shape_cast %148 : vector<2x10xf32> to vector<1x2x10xf32>
    tpu.vector_store %arg3[%c0_78, %c0_79, %c70], %151 {strides = array<i32>} : memref<1x2x80xf32, #tpu.memory_space<vmem>>, vector<1x2x10xf32>,
    return
  }
  func.func @transform_0(%arg0: i32, %arg1: memref<2x8xi32, #tpu.memory_space<smem>>) -> (i32, i32, i32, i32) {
    %c0_i32 = arith.constant 0 : i32
    %c0_i32_0 = arith.constant 0 : i32
    %c0_i32_1 = arith.constant 0 : i32
    %c0_i32_2 = arith.constant 0 : i32
    return %arg0, %c0_i32, %c0_i32_0, %c0_i32_1 : i32, i32, i32, i32
  }
  func.func @transform_1(%arg0: i32, %arg1: memref<2x8xi32, #tpu.memory_space<smem>>) -> (i32, i32, i32) {
    %c0_i32 = arith.constant 0 : i32
    %c0_i32_0 = arith.constant 0 : i32
    %c0_i32_1 = arith.constant 0 : i32
    return %arg0, %c0_i32, %c0_i32_0 : i32, i32, i32
  }
}

</mosaic_0001>

<bundles_post_ra>
// kernel: _forward.1
= control target key start
LH: loop header
LB: loop body
LE: loop exit
PB: predicated region body
PF: predicated region fallthrough
CT: control target
= control target key end

     0   :  { %s644_s0 = inlined_call_operand.vmem [shape: s32[2,8], index: 0, kind: input, shape index: {}]   ;;  %s645_s1 = inlined_call_operand.vmem [shape: f32[2,8,2,10], index: 1, kind: input, shape index: {}]   ;;  %s646_s2 = inlined_call_operand.hbm [shape: f32[2,2,80], index: 2, kind: output, shape index: {}]  }
   0x1   :  { %s7_s11 = sshll.u32 %s644_s0, 4  ;;  %s8_s11 = int_to_ptr.vmem [resolvable:$true] %s7_s11 }
   0x2   :  { %s411_s12 = scalar_lea.vmem %s8_s11, 32  ;;  %p416_p1 = scmp.lt.s32.totalorder %s8_s11, %s8_s11 }
   0x3   :  { %p412_p0 = scmp.ne.s32.totalorder %s8_s11, %s411_s12  ;;  %p417_p2 = scmp.lt.s32.totalorder %s411_s12, %s411_s12 }
   0x5   :  { %p418_p3 = por %p417_p2, %p416_p1 }
   0x7   :  { %p419_p4 = pnand %p418_p3, %p412_p0 }
   0x9   :  { %422 = shalt.err (!%p419_p4)  }
   0xa   :  { %s487_s13 = smov [#allocation3]  }
   0xb   :  { %10 = dma.vmem_to_smem %s8_s11, 32, %s487_s13, [#allocation2] }
   0xc   :  { %465 = dma.done.wait [#allocation2], 32 }
   0xd   :  { %466 = vsyncadd [#allocation2], 4294967264 }
   0xe   :  { %12 = sfence }
   0xf   :  { %13 = vsyncpa [#allocation5], 0 }
  0x10   :  { %15 = vsyncpa [#allocation5 + $0x1], 0  ;;  %s514_s14 = smov 0   ;;  %s516_s15 = smov 0  }
  0x11   :  { %s518_s0 = smov 0   ;;  %s520_s16 = smov 0  }
  0x12 LB: > { %s535_s17 = sadd.s32 4294967295, %s485_s16   ;;  %s343_s18 = sadd.s32 4294967294, %s485_s16   ;;  %s485_s16 = sphi %s520_s16, %s652_s16   ;;  %s481_s0 = sphi %s518_s0, %s651_s0   ;;  %s477_s15 = sphi %s516_s15, %s650_s15   ;;  %s473_s14 = sphi %s514_s14, %s649_s14  }
  0x13   : > { %s539_s19 = sadd.s32 1, %s485_s16   ;;  %s54_s20 = sadd.s32 1, %s481_s0 }
  0x14   : > { %s51_s21 = ssub.s32 %s485_s16, %s539_s19  ;;  %p64_p5 = scmp.ne.s32.totalorder %s481_s0, %s477_s15 }
  0x15   : > { %p52_p6 = scmp.eq.s32.totalorder %s51_s21, 0  ;;  %p65_p7 = scmp.eq.s32.totalorder %s535_s17, 1 }
  0x16   : > { %p70_p8 = scmp.ne.s32.totalorder %s477_s15, %s473_s14  ;;  %p71_p9 = scmp.eq.s32.totalorder %s343_s18, 1 }
  0x17   : > { %s550_s22 = scalar_select %p52_p6, %s481_s0, %s54_s20  }
  0x18   : > { %p552_p10 = por %p65_p7, %p64_p5  ;;  %p556_p11 = por %p71_p9, %p70_p8 }
  0x19   : > { %p346_p12 = scmp.ge.s32.totalorder %s485_s16, 1  ;;  %p97_p13 = scmp.lt.s32.totalorder %s485_s16, 3 }
  0x1b   : > { %p98_p0 = pnand %p346_p12, %p97_p13 }
  0x1c   : > { %p117_p1 = scmp.lt.s32.totalorder (!%p98_p0), %s535_s17, 1  ;;  %s564_s25 = sshll.u32 (!%p98_p0), %s535_s17, 7 }
  0x1d   : > { %101 = sbr.rel (%p98_p0) target bundleno = 186 (0xba), region = 24  ;;  %s135_s26 = sadd.s32 (!%p98_p0), 1, %s564_s25 }
  0x1e   : > { %s136_s28 = sld [smem:[#allocation3 + %s135_s26]] (!%p98_p0)  ;;  %s169_s29 = sadd.s32 (!%p98_p0), 3, %s564_s25 }
  0x1f   : > { %s170_s3 = sld [smem:[#allocation3 + %s169_s29]] (!%p98_p0)  ;;  %s152_s7 = sadd.s32 (!%p98_p0), 2, %s564_s25 }
  0x20   : > { %s153_s8 = sld [smem:[#allocation3 + %s152_s7]] (!%p98_p0)  ;;  %s186_s9 = sadd.s32 (!%p98_p0), 4, %s564_s25 }
  0x21   : > { %s187_s10 = sld [smem:[#allocation3 + %s186_s9]] (!%p98_p0)  ;;  %s203_s12 = sadd.s32 (!%p98_p0), 5, %s564_s25 }
  0x22   : > { %s118_s27 = scalar_select %p117_p1, %s535_s17, 1 }
  0x23   : > { %s579_s21 = sld [smem:[#allocation3 + %s203_s12]]  ;;  %s220_s26 = sadd.s32 6, %s564_s25 }
  0x24   : > { %s363_s30 = sshll.u32 %s118_s27, 4  ;;  %s352_s11 = sshll.u32 %s136_s28, 1 }
  0x25   : > { %s572_s6 = scalar_lea.vmem %s645_s1, %s363_s30  ;;  %s354_s18 = sshll.u32 %s170_s3, 1 }
  0x26   : > { %s138_s13 = scalar_lea.vmem %s572_s6, %s352_s11  ;;  %s172_s20 = scalar_lea.vmem %s572_s6, %s354_s18 }
  0x27   : > { %v139_v0 = vld [vmem:[%s138_s13] sm:$0x3]  ;;  %s353_s27 = sshll.u32 %s153_s8, 1  ;;  %s582_s29 = sld [smem:[#allocation3 + %s220_s26]] }
  0x28   : > { %vm140_vm0 = vcmp.ne.f32.partialorder %v139_v0, %v139_v0  ;;  %v173_v1 = vld [vmem:[%s172_s20] sm:$0x3]  ;;  %s155_s28 = scalar_lea.vmem %s572_s6, %s353_s27  ;;  %s355_s30 = sshll.u32 %s187_s10, 1 }
  0x29   : > { %v141_v2 = vsel %vm140_vm0, 0.0, %v139_v0  ;;  %vm174_vm1 = vcmp.ne.f32.partialorder %v173_v1, %v173_v1  ;;  %v156_v5 = vld [vmem:[%s155_s28] sm:$0x3]  ;;  %s189_s3 = scalar_lea.vmem %s572_s6, %s355_s30  ;;  %s237_s4 = sadd.s32 7, %s564_s25 }
  0x2a   : > { %vm142_vm2 = vcmp.eq.f32.partialorder %v141_v2, inf  ;;  %v175_v3 = vsel %vm174_vm1, 0.0, %v173_v1  ;;  %vm157_vm5 = vcmp.ne.f32.partialorder %v156_v5, %v156_v5  ;;  %v190_v7 = vld [vmem:[%s189_s3] sm:$0x3]  ;;  %s356_s5 = sshll.u32 %s579_s21, 1  ;;  %s588_s7 = sld [smem:[#allocation3 + %s237_s4]] }
  0x2b   : > { %v143_v4 = vsel %vm142_vm2, 3.4028235e+38, %v141_v2  ;;  %vm176_vm3 = vcmp.eq.f32.partialorder %v175_v3, inf  ;;  %v158_v9 = vsel %vm157_vm5, 0.0, %v156_v5  ;;  %vm191_vm7 = vcmp.ne.f32.partialorder %v190_v7, %v190_v7  ;;  %s488_s8 = smov 10   ;;  %s206_s9 = scalar_lea.vmem %s572_s6, %s356_s5 }
  0x2c   : > { %vm144_vm4 = vcmp.eq.f32.partialorder %v143_v4, -inf  ;;  %v177_v6 = vsel %vm176_vm3, 3.4028235e+38, %v175_v3  ;;  %vm159_vm8 = vcmp.eq.f32.partialorder %v158_v9, inf  ;;  %v192_v11 = vsel %vm191_vm7, 0.0, %v190_v7  ;;  %s489_s10 = smov 30  }
  0x2d   : > { %v145_v8 = vsel %vm144_vm4, -3.4028235e+38, %v143_v4  ;;  %vm178_vm6 = vcmp.eq.f32.partialorder %v177_v6, -inf  ;;  %v160_v12 = vsel %vm159_vm8, 3.4028235e+38, %v158_v9  ;;  %vm193_vm9 = vcmp.eq.f32.partialorder %v192_v11, inf }
  0x2e   : > { %147 = vrot.lane.b32.xlu0 %v145_v8, %s488_s8  ;;  %v179_v10 = vsel %vm178_vm6, -3.4028235e+38, %v177_v6  ;;  %v207_v13 = vld [vmem:[%s206_s9] sm:$0x3]  ;;  %s357_s11 = sshll.u32 %s582_s29, 1  ;;  %vm161_vm10 = vcmp.eq.f32.partialorder %v160_v12, -inf }
  0x2f   : > { %181 = vrot.lane.b32.xlu1 %v179_v10, %s489_s10  ;;  %v194_v14 = vsel %vm193_vm9, 3.4028235e+38, %v192_v11  ;;  %vm208_vm11 = vcmp.ne.f32.partialorder %v207_v13, %v207_v13  ;;  %s223_s12 = scalar_lea.vmem %s572_s6, %s357_s11  ;;  %s594_s13 = sld [smem:[#allocation3 + %s564_s25]]  ;;  %v162_v15 = vsel %vm161_vm10, -3.4028235e+38, %v160_v12  ;;  %vm133_vm7 = vcmask 74752  }
  0x30   : > { %vm195_vm12 = vcmp.eq.f32.partialorder %v194_v14, -inf  ;;  %v209_v16 = vsel %vm208_vm11, 0.0, %v207_v13  ;;  %v224_v17 = vld [vmem:[%s223_s12] sm:$0x3]  ;;  %s490_s18 = smov 20   ;;  %s491_s20 = smov 40  }
  0x31   : > { %v196_v18 = vsel %vm195_vm12, -3.4028235e+38, %v194_v14  ;;  %vm210_vm13 = vcmp.eq.f32.partialorder %v209_v16, inf  ;;  %vm225_vm14 = vcmp.ne.f32.partialorder %v224_v17, %v224_v17  ;;  %s358_s21 = sshll.u32 %s588_s7, 1  ;;  %s492_s26 = smov 50   ;;  %vm150_vm9 = vcmask 156752  }
  0x32   : > { %164 = vrot.lane.b32.xlu0 %v162_v15, %s490_s18  ;;  %v211_v19 = vsel %vm210_vm13, 3.4028235e+38, %v209_v16  ;;  %v226_v20 = vsel %vm225_vm14, 0.0, %v224_v17  ;;  %s240_s25 = scalar_lea.vmem %s572_s6, %s358_s21  ;;  %s114_s29 = sand.u32 1, %s477_s15   ;;  %vm167_vm10 = vcmask 238752   ;;  %vm184_vm11 = vcmask 320752  }
  0x33   : > { %198 = vrot.lane.b32.xlu1 %v196_v18, %s491_s20  ;;  %vm212_vm15 = vcmp.eq.f32.partialorder %v211_v19, -inf  ;;  %vm227_vm0 = vcmp.eq.f32.partialorder %v226_v20, inf  ;;  %v241_v23 = vld [vmem:[%s240_s25] sm:$0x3]  ;;  %s493_s30 = smov 60   ;;  %s347_s3 = sshll.u32 %s114_s29, 1 }
  0x34   : > { %v213_v21 = vsel %vm212_vm15, -3.4028235e+38, %v211_v19  ;;  %v228_v22 = vsel %vm227_vm0, 3.4028235e+38, %v226_v20  ;;  %vm242_vm2 = vcmp.ne.f32.partialorder %v241_v23, %v241_v23  ;;  %s494_s4 = smov 70   ;;  %s116_s5 = scalar_lea.vmem [#allocation4], %s347_s3 }
  0x35   : > { %vm229_vm1 = vcmp.eq.f32.partialorder %v228_v22, -inf  ;;  %s351_s27 = sshll.u32 %s594_s13, 1  ;;  %v243_v25 = vsel %vm242_vm2, 0.0, %v241_v23  ;;  %vm201_vm12 = vcmask 402752   ;;  %vm218_vm13 = vcmask 484752   ;;  %s268_s7 = sshll.u32 %s116_s5, 4  ;;  %s269_s7 = int_to_ptr.vmem [resolvable:$true] %s268_s7 }
  0x36   : > { %215 = vrot.lane.b32.xlu0 %v213_v21, %s492_s26  ;;  %v230_v24 = vsel %vm229_vm1, -3.4028235e+38, %v228_v22  ;;  %s125_s28 = scalar_lea.vmem %s572_s6, %s351_s27  ;;  %vm244_vm3 = vcmp.eq.f32.partialorder %v243_v25, inf  ;;  %vm235_vm14 = vcmask 566752   ;;  %s360_s6 = sshll.u32 %s535_s17, 5  ;;  %vm252_vm15 = vcmask 648752  }
  0x37   : > { %232 = vrot.lane.b32.xlu1 %v230_v24, %s493_s30  ;;  %v126_v26 = vld [vmem:[%s125_s28] sm:$0x3]  ;;  %v245_v27 = vsel %vm244_vm3, 3.4028235e+38, %v243_v25  ;;  %s607_s10 = scalar_lea.hbm %s646_s2, %s360_s6  ;;  %s255_s11 = scalar_lea.sflag [#allocation5], %s114_s29 }
  0x38   : > { %vm127_vm4 = vcmp.ne.f32.partialorder %v126_v26, %v126_v26  ;;  %vm246_vm5 = vcmp.eq.f32.partialorder %v245_v27, -inf  ;;  %s423_s12 = scalar_lea.vmem %s269_s7, 32  ;;  %s495_s17 = smov [#allocation4]  }
  0x39   : > { %v128_v28 = vsel %vm127_vm4, 0.0, %v126_v26  ;;  %v247_v29 = vsel %vm246_vm5, -3.4028235e+38, %v245_v27  ;;  %p424_p2 = scmp.ne.s32.totalorder %s269_s7, %s423_s12  ;;  %s427_s13 = sshll.u32 %s495_s17, 4  ;;  %s428_s13 = int_to_ptr.vmem [resolvable:$false] %s427_s13 }
  0x3a   : > { %vm129_vm6 = vcmp.eq.f32.partialorder %v128_v28, inf  ;;  %249 = vrot.lane.b32.xlu0 %v247_v29, %s494_s4  ;;  %s429_s18 = scalar_lea.vmem %s428_s13, 64  ;;  %p430_p5 = scmp.lt.s32.totalorder %s269_s7, %s428_s13 }
  0x3b   : > { %v130_v30 = vsel %vm129_vm6, 3.4028235e+38, %v128_v28  ;;  %p425_p3 = pnand %p424_p2, %p552_p10  ;;  %p431_p6 = scmp.lt.s32.totalorder %s429_s18, %s423_s12 }
  0x3c   : > { %vm131_vm8 = vcmp.eq.f32.partialorder %v130_v30, -inf }
  0x3d   : > { %v132_v31 = vsel %vm131_vm8, -3.4028235e+38, %v130_v30  ;;  %p426_p4 = pneg %p425_p3  ;;  %p432_p7 = por %p431_p6, %p430_p5 }
  0x3e   : > { %134 = vst.msk [vmem:[%s116_s5] sm:$0x3] %vm133_vm7, %v132_v31 }
  0x3f   : > { %p433_p8 = pnand %p432_p7, %p426_p4 }
  0xa0   : > { %v148_v32 = vpop.permute.xlu0 %147 }
  0xa1   : > { %151 = vst.msk [vmem:[%s116_s5] sm:$0x3] %vm150_vm9, %v148_v32  ;;  %v182_v33 = vpop.permute.xlu1 %181 }
  0xa4   : > { %v165_v34 = vpop.permute.xlu0 %164 }
  0xa5   : > { %168 = vst.msk [vmem:[%s116_s5] sm:$0x3] %vm167_vm10, %v165_v34  ;;  %v199_v35 = vpop.permute.xlu1 %198 }
  0xa6   : > { %185 = vst.msk [vmem:[%s116_s5] sm:$0x3] %vm184_vm11, %v182_v33 }
  0xa7   : > { %202 = vst.msk [vmem:[%s116_s5] sm:$0x3] %vm201_vm12, %v199_v35 }
  0xa8   : > { %v216_v36 = vpop.permute.xlu0 %215 }
  0xa9   : > { %219 = vst.msk [vmem:[%s116_s5] sm:$0x3] %vm218_vm13, %v216_v36  ;;  %v233_v37 = vpop.permute.xlu1 %232 }
  0xaa   : > { %236 = vst.msk [vmem:[%s116_s5] sm:$0x3] %vm235_vm14, %v233_v37 }
  0xac   : > { %v250_v38 = vpop.permute.xlu0 %249 }
  0xad   : > { %253 = vst.msk [vmem:[%s116_s5] sm:$0x3] %vm252_vm15, %v250_v38 }
  0xae   : > { %436 = shalt.err (!%p433_p8)
}
  0xaf   : > { %s437_s20 = scalar_lea.hbm %s607_s10, 32  ;;  %s441_s26 = scalar_lea.hbm %s646_s2, 64 }
  0xb0   : > { %p438_p9 = scmp.ne.s32.totalorder %s607_s10, %s437_s20  ;;  %p442_p0 = scmp.lt.s32.totalorder %s607_s10, %s646_s2 }
  0xb1   : > { %p443_p1 = scmp.lt.s32.totalorder %s441_s26, %s437_s20 }
  0xb2   : > { %p439_p12 = pnand %p438_p9, %p552_p10 }
  0xb3   : > { %p444_p2 = por %p443_p1, %p442_p0 }
  0xb4   : > { %p440_p13 = pneg %p439_p12 }
  0xb6   : > { %p445_p3 = pnand %p444_p2, %p440_p13 }
  0xb8   : > { %448 = shalt.err (!%p445_p3)
}
  0xb9   : > { %364 = dma.vmem_to_hbm [thread:$0]  (%p552_p10), %s269_s7, 32, %s607_s10, %s255_s11  }
  0xba PF: > { %p370_p4 = scmp.ge.s32.totalorder %s485_s16, 2  ;;  %s280_s28 = sand.u32 1, %s473_s14  }
  0xbb   : > { %s281_s30 = scalar_lea.sflag [#allocation5], %s280_s28 }
  0xbc   : > { %p367_p5 = pnand %p370_p4, %p556_p11 }
  0xbe   : > { %p368_p6 = pneg %p367_p5 }
  0xc0   : > { %468 = dma.done.wait (%p368_p6), %s281_s30, 32  }
  0xc1   : > { %470 = vsyncadd (%p368_p6), %s281_s30, 4294967264  ;;  %p18_p7 = scmp.ge.s32.totalorder %s539_s19, 4   ;;  %s649_s14 = smov %s477_s15 }
  0xc2   : > { %s650_s15 = smov %s481_s0  ;;  %s651_s0 = smov %s550_s22 }
  0xc3   : > { %s652_s16 = smov %s539_s19  ;;  %20 = sbr.rel (!%p18_p7) target bundleno = 18 (0x12), region = 67 }
  0xc8   :  { %286 = vsyncpa [#allocation5], 1 }
  0xc9   :  { %288 = vsyncpa [#allocation5 + $0x1], 1 }

</bundles_post_ra>
